<compile_context>
chip_gen: v7x
topology: tpu7x:2x2x1
jax: 0.10.0
libtpu: 0.0.40
codegen_flags: <defaults>
</compile_context>

<pallas_src>
import functools

import jax
import jax.numpy as jnp
from jax.experimental import pallas as pl
from jax.experimental.pallas import tpu as pltpu


def _quadratic_iso_kernel(pos2_ref, log_std_ref, out_ref):
    # pos2_ref:    (K*K, 1)      f32  squared radius of each kernel tap (column)
    # log_std_ref: (1, tile_n)   f32  this tile's slice of the flattened (O*I,) log_std
    # out_ref:     (K*K, tile_n) out_dtype  lane-dense output slab
    neg_inv_var = -jnp.exp(-2.0 * log_std_ref[...])            # EUP; negate (1, tile_n) only
    # Outer product via broadcasting: (K*K, 1) * (1, tile_n) -> (K*K, tile_n)
    out_ref[...] = (pos2_ref[...] * neg_inv_var).astype(out_ref.dtype)


def _round_up(x, m):
    return -(-x // m) * m


@functools.partial(jax.jit, static_argnames=("kernel_size", "out_dtype"))
def quadratic_kernel_iso2d(log_std, kernel_size, out_dtype=jnp.float32):
    """Pallas equivalent of QuadraticKernelIso2D.forward(): returns an OIHW tensor."""
    O, I = log_std.shape
    K = int(kernel_size)
    KK = K * K
    N = O * I

    # Squared-radius column (== _pos_grid.pow(2).sum(-2) flattened); constant-folded by jit.
    coords = jnp.arange(K, dtype=jnp.float32) - (K // 2)
    yy, xx = jnp.meshgrid(coords, coords, indexing="ij")
    pos2_col = (yy * yy + xx * xx).reshape(KK, 1)

    # --- Tile selection (static Python) -------------------------------------------------
    n_pad_min = _round_up(N, 128)
    # Big tiles to amortise per-step overhead; aim for >= ~4 steps at large O*I (v7x TCs).
    tile_target = max(2048, _round_up(-(-n_pad_min // 4), 128))
    # Cap so the double-buffered output+input tiles stay ~<= 8 MiB (v5e-safe):
    #   2 bufs * (KK + 1) rows * tile_n lanes * 4 B  <=  budget
    vmem_budget = 8 * 1024 * 1024
    tile_cap = max(128, (vmem_budget // (8 * (KK + 1))) // 128 * 128)
    tile_n = min(n_pad_min, tile_target, tile_cap)
    n_pad = _round_up(N, tile_n)
    grid = (n_pad // tile_n,)

    # Pad the flattened scale params (exp(0)=1 in pad lanes is harmless; sliced off below).
    log_std_flat = jnp.pad(
        log_std.reshape(1, N).astype(jnp.float32), ((0, 0), (0, n_pad - N))
    )

    out2d = pl.pallas_call(
        _quadratic_iso_kernel,
        out_shape=jax.ShapeDtypeStruct((KK, n_pad), out_dtype),
        grid_spec=pltpu.PrefetchScalarGridSpec(
            num_scalar_prefetch=0,
            grid=grid,
            in_specs=[
                pl.BlockSpec((KK, 1), lambda j: (0, 0)),       # tiny, revisited block
                pl.BlockSpec((1, tile_n), lambda j: (0, j)),   # per-tile scale params
            ],
            out_specs=pl.BlockSpec((KK, tile_n), lambda j: (0, j)),
        ),
        compiler_params=pltpu.CompilerParams(
            dimension_semantics=("parallel",),                 # megacore split on v7x
            vmem_limit_bytes=32 * 1024 * 1024,                 # headroom; tile cap keeps use ~<=9 MiB
        ),
    )(pos2_col, log_std_flat)

    # (K*K, O*I) -> (O, I, K, K); fused by XLA since it lives under the same jit.
    # TODO(synk): if the downstream conv consumer can accept the (K*K, O*I) layout
    # directly, skip this relayout entirely and save ~half the HBM traffic.
    return out2d[:, :N].T.reshape(O, I, K, K)


def make_log_std_ss(key, in_channels, out_channels, kernel_size):
    """Deterministic 'ss' (scale-space) initialisation, mirroring the PyTorch __init__."""
    n = out_channels * in_channels
    hi = 2.0 * (kernel_size // 2) ** 2
    spaced_vars = jnp.linspace(1.0, hi, n, dtype=jnp.float32)
    perm = jax.random.permutation(key, n)
    variances = spaced_vars[perm].reshape(out_channels, in_channels)
    return 0.5 * jnp.log(variances)                            # log_std = 0.5 * log(var)


if __name__ == "__main__":
    in_channels, out_channels, kernel_size = 5, 6, 3

    key = jax.random.PRNGKey(0)
    log_std = make_log_std_ss(key, in_channels, out_channels, kernel_size)

    out = quadratic_kernel_iso2d(log_std, kernel_size)
    out = jax.block_until_ready(out)

    # Reference check (plain JAX, mirrors the PyTorch forward).
    coords = jnp.arange(kernel_size, dtype=jnp.float32) - (kernel_size // 2)
    yy, xx = jnp.meshgrid(coords, coords, indexing="ij")
    r2 = yy * yy + xx * xx
    ref = -(r2[None, None] / jnp.exp(2.0 * log_std)[:, :, None, None])

    assert out.shape == (out_channels, in_channels, kernel_size, kernel_size)
    assert jnp.allclose(out, ref, atol=1e-6, rtol=1e-6)

    print("KERNEL_OK")
</pallas_src>

<mosaic_0001>
module attributes {stable_mosaic.version = 11 : i64} {
  func.func @_quadratic_iso_kernel(%arg0: i32, %arg1: memref<9x1xf32, #tpu.memory_space<vmem>>, %arg2: memref<1x128xf32, #tpu.memory_space<vmem>>, %arg3: memref<9x128xf32, #tpu.memory_space<vmem>>) attributes {dimension_semantics = [#tpu.dimension_semantics<parallel>], iteration_bounds = array<i64: 1>, scalar_prefetch = 0 : i64, scratch_operands = 0 : i64, tpu.core_type = #tpu.core_type<tc>, window_params = [{pipeline_mode = #tpu.pipeline_mode<synchronous>, transform_indices = @transform_0, window_bounds = array<i64: 9, 1>}, {transform_indices = @transform_1, window_bounds = array<i64: 1, 128>}, {transform_indices = @transform_2, window_bounds = array<i64: 9, 128>}]} {
    %c0 = arith.constant 0 : index
    %c0_0 = arith.constant 0 : index
    %0 = vector.load %arg2[%c0, %c0_0] : memref<1x128xf32, #tpu.memory_space<vmem>>, vector<1x128xf32>
    %cst = arith.constant -2.000000e+00 : f32
    %1 = vector.broadcast %cst : f32 to vector<1x128xf32>
    %2 = arith.mulf %1, %0 : vector<1x128xf32>
    %3 = math.exp %2 : vector<1x128xf32>
    %cst_1 = arith.constant 0.000000e+00 : f32
    %4 = vector.broadcast %cst_1 : f32 to vector<1x128xf32>
    %5 = arith.subf %4, %3 : vector<1x128xf32>
    %c0_2 = arith.constant 0 : index
    %c0_3 = arith.constant 0 : index
    %6 = vector.load %arg1[%c0_2, %c0_3] : memref<9x1xf32, #tpu.memory_space<vmem>>, vector<9x1xf32>
    %7 = vector.broadcast %6 : vector<9x1xf32> to vector<9x128xf32>
    %8 = vector.broadcast %5 : vector<1x128xf32> to vector<9x128xf32>
    %9 = arith.mulf %7, %8 : vector<9x128xf32>
    %c0_4 = arith.constant 0 : index
    %c0_5 = arith.constant 0 : index
    %10 = vector.load %arg3[%c0_4, %c0_5] : memref<9x128xf32, #tpu.memory_space<vmem>>, vector<9x128xf32>
    tpu.vector_store %arg3[%c0_4, %c0_5], %9 {strides = array<i32>} : memref<9x128xf32, #tpu.memory_space<vmem>>, vector<9x128xf32>,
    return
  }
  func.func @transform_0(%arg0: i32) -> (i32, i32) {
    %c0_i32 = arith.constant 0 : i32
    %c0_i32_0 = arith.constant 0 : i32
    %c0_i32_1 = arith.constant 0 : i32
    return %c0_i32, %c0_i32_0 : i32, i32
  }
  func.func @transform_1(%arg0: i32) -> (i32, i32) {
    %c0_i32 = arith.constant 0 : i32
    %c0_i32_0 = arith.constant 0 : i32
    return %c0_i32, %arg0 : i32, i32
  }
  func.func @transform_2(%arg0: i32) -> (i32, i32) {
    %c0_i32 = arith.constant 0 : i32
    %c0_i32_0 = arith.constant 0 : i32
    return %c0_i32, %arg0 : i32, i32
  }
}

</mosaic_0001>

<bundles_post_ra>
// kernel: quadratic_kernel_iso2d.1
= control target key start
LH: loop header
LB: loop body
LE: loop exit
PB: predicated region body
PF: predicated region fallthrough
CT: control target
= control target key end

     0   :  { %v46_v0 = vmov 0   ;;  %v29_v6 = vlaneseq  ;;  %s77_s0 = inlined_call_operand.vmem [shape: f32[9,1], index: 0, kind: input, shape index: {}]   ;;  %s78_s1 = inlined_call_operand.vmem [shape: f32[1,128], index: 1, kind: input, shape index: {}]   ;;  %s79_s2 = inlined_call_operand.vmem [shape: f32[9,128], index: 2, kind: output, shape index: {}]  }
   0x1   :  { %43 = vset.pattern.permute.xlu0 %v46_v0  ;;  %v16_v1 = vld [vmem:[%s77_s0] sm:$0xff]  ;;  %v17_v2 = vld [vmem:[%s77_s0 + $0x8] sm:$0x1] }
   0x2   :  { %20 = vperm.xlu0 %43, %v16_v1   ;;  %v11_v3 = vld [vmem:[%s78_s1] sm:$0x1]  ;;  %v30_v7 = vshrl.u32 %v29_v6, 7 }
   0x3   :  { %v12_v4 = vmul.f32 -2.0, %v11_v3 }
   0x4   :  { %v31_v10 = vsub.s32 0, %v30_v7 }
   0x5   :  { %v13_v5 = vmul.f32 1.442695, %v12_v4 }
   0x6   :  { %25 = vperm.xlu0 %43, %v17_v2  }
   0x7   :  { %44 = vpow2.f32 %v13_v5 }
  0x11   :  { %v45_v8 = vpop.eup %44 }
  0x12   :  { %v15_v9 = vsub.f32 0.0, %v45_v8 }
  0x14   :  { %v32_v11 = vrot.slane %v15_v9, %v31_v10 }
  0x81   :  { %v21_v12 = vpop.permute.xlu0 %20 }
  0x82   :  { %v34_v13 = vmul.f32 %v32_v11, %v21_v12 }
  0x84   :  { %36 = vst [vmem:[%s79_s2] sm:$0xff] %v34_v13 }
  0x85   :  { %v26_v14 = vpop.permute.xlu0 %25 }
  0x86   :  { %v35_v15 = vmul.f32 %v32_v11, %v26_v14 }
  0x88   :  { %37 = vst [vmem:[%s79_s2 + $0x8] sm:$0x1] %v35_v15 }

</bundles_post_ra>
